<compile_context>
chip_gen: v6e
topology: v6e:2x2x1
jax: 0.10.0
libtpu: 0.0.40
codegen_flags: <defaults>
</compile_context>

<pallas_src>
import jax
import jax.numpy as jnp
import numpy as np
from jax.experimental import pallas as pl
from jax.experimental.pallas import tpu as pltpu

SELU_ALPHA = 1.6732632423543772
SELU_SCALE = 1.0507009873554805


def _round_up(n, m):
    return ((n + m - 1) // m) * m


def _selu(x):
    # exp only on the non-positive lanes (min avoids inf in the unselected branch).
    return SELU_SCALE * jnp.where(
        x > 0, x, SELU_ALPHA * (jnp.exp(jnp.minimum(x, 0.0)) - 1.0))


def _sigmoid_eup(x):
    # sigmoid(x) == 0.5 * (tanh(x/2) + 1); tanh runs on the EUP slot.
    return 0.5 * jnp.tanh(0.5 * x) + 0.5


def net_kernel(x_ref, w1_ref, b1_ref, w2_ref, w3_ref, w4_ref, w5_ref, b5_ref,
               o_ref):
    # Activations are [features, TILE_B]  (batch on lanes -> lane-dense).
    xb = x_ref[...].astype(jnp.bfloat16)                       # (D, TB)

    h = jnp.dot(w1_ref[...], xb,
                preferred_element_type=jnp.float32) + b1_ref[...]   # (6D, TB)
    h = _selu(h)
    # batchnorm1 / drop1 are no-ops on the value path (see module note above).

    h = _selu(jnp.dot(w2_ref[...], h.astype(jnp.bfloat16),
                      preferred_element_type=jnp.float32))           # (3D, TB)
    h = _selu(jnp.dot(w3_ref[...], h.astype(jnp.bfloat16),
                      preferred_element_type=jnp.float32))           # (2D, TB)
    h = _selu(jnp.dot(w4_ref[...], h.astype(jnp.bfloat16),
                      preferred_element_type=jnp.float32))           # (D,  TB)

    # fc5: output is a single feature -> do it as VPU mul + sublane (XLU) reduce
    # instead of a 1-lane-wide MXU matmul; result is already lane-dense (1, TB).
    logits = jnp.sum(h * w5_ref[...], axis=0, keepdims=True) + b5_ref[...]
    o_ref[...] = _sigmoid_eup(logits)


def net_forward(x, params, *, tile_b=4096):
    """x: [B, D] float32 -> [B] float32 (post-sigmoid, squeezed)."""
    B, D = x.shape
    w1, b1, w2, w3, w4, w5, b5 = params
    H1, H2, H3, H4 = w1.shape[0], w2.shape[0], w3.shape[0], w4.shape[0]

    # Pick a batch tile: large for throughput, but don't over-pad tiny batches.
    # (Keep it a multiple of 128 so MXU/lane tiles stay unpadded on all gens;
    #  cap well under v7x's 64 MiB VMEM even with double-buffered I/O.)
    tile_b = max(128, min(tile_b, _round_up(B, 128)))
    b_pad = _round_up(B, tile_b)
    num_tiles = b_pad // tile_b

    # Layout plumbing (outside the kernel): put batch on the lane dimension.
    x_t = x.T                                   # (D, B)
    if b_pad != B:
        x_t = jnp.pad(x_t, ((0, 0), (0, b_pad - B)))

    out = pl.pallas_call(
        net_kernel,
        out_shape=jax.ShapeDtypeStruct((1, b_pad), jnp.float32),
        grid=(num_tiles,),
        in_specs=[
            # x tile: streamed per grid step.
            pl.BlockSpec((D, tile_b), lambda i: (0, i)),
            # Weights / biases: constant index_map -> resident in VMEM.
            pl.BlockSpec((H1, D), lambda i: (0, 0)),   # w1  (bf16)
            pl.BlockSpec((H1, 1), lambda i: (0, 0)),   # b1  (f32 column)
            pl.BlockSpec((H2, H1), lambda i: (0, 0)),  # w2  (bf16)
            pl.BlockSpec((H3, H2), lambda i: (0, 0)),  # w3  (bf16)
            pl.BlockSpec((H4, H3), lambda i: (0, 0)),  # w4  (bf16)
            pl.BlockSpec((H4, 1), lambda i: (0, 0)),   # w5  (f32 column, VPU)
            pl.BlockSpec((1, 1), lambda i: (0, 0)),    # b5  (f32 scalar)
        ],
        out_specs=pl.BlockSpec((1, tile_b), lambda i: (0, i)),
        compiler_params=pltpu.CompilerParams(
            dimension_semantics=("parallel",)),
    )(x_t, w1, b1, w2, w3, w4, w5, b5)

    return out[0, :B]


def init_params(key, input_dim):
    """PyTorch-default init U(-1/sqrt(fan_in), 1/sqrt(fan_in)).

    Weights are stored in the PyTorch-native [out, in] layout (the kernel runs
    feature-major), matmul weights in bf16; biases and the fc5 weight vector
    (used on the VPU) in f32.
    """
    D = input_dim
    layer_dims = [
        (D, 6 * D, True),       # fc1
        (6 * D, 3 * D, False),  # fc2
        (3 * D, 2 * D, False),  # fc3
        (2 * D, 1 * D, False),  # fc4
        (D, 1, True),           # fc5
    ]
    keys = jax.random.split(key, 2 * len(layer_dims))
    raw = []
    for i, (fin, fout, has_bias) in enumerate(layer_dims):
        bound = 1.0 / np.sqrt(fin)
        w = jax.random.uniform(keys[2 * i], (fout, fin), jnp.float32,
                               minval=-bound, maxval=bound)
        b = None
        if has_bias:
            b = jax.random.uniform(keys[2 * i + 1], (fout, 1), jnp.float32,
                                   minval=-bound, maxval=bound)
        raw.append((w, b))

    (w1, b1), (w2, _), (w3, _), (w4, _), (w5, b5) = raw
    params = (
        w1.astype(jnp.bfloat16),          # (6D, D)
        b1,                               # (6D, 1) f32
        w2.astype(jnp.bfloat16),          # (3D, 6D)
        w3.astype(jnp.bfloat16),          # (2D, 3D)
        w4.astype(jnp.bfloat16),          # (D, 2D)
        w5.T,                             # (D, 1) f32  (column for the VPU reduce)
        b5,                               # (1, 1) f32
    )
    return params


def net_reference(x, params):
    """Pure-JAX reference mirroring the kernel's math (same dtypes/op order)."""
    w1, b1, w2, w3, w4, w5, b5 = params
    xt = x.T.astype(jnp.bfloat16)
    h = _selu(jnp.dot(w1, xt, preferred_element_type=jnp.float32) + b1)
    h = _selu(jnp.dot(w2, h.astype(jnp.bfloat16),
                      preferred_element_type=jnp.float32))
    h = _selu(jnp.dot(w3, h.astype(jnp.bfloat16),
                      preferred_element_type=jnp.float32))
    h = _selu(jnp.dot(w4, h.astype(jnp.bfloat16),
                      preferred_element_type=jnp.float32))
    logits = jnp.sum(h * w5, axis=0) + b5[0, 0]
    return jax.nn.sigmoid(logits)


if __name__ == "__main__":
    input_dim = 32
    batch = 8

    key = jax.random.PRNGKey(0)
    k_x, k_p = jax.random.split(key)
    x = jax.random.normal(k_x, (batch, input_dim), dtype=jnp.float32)
    params = init_params(k_p, input_dim)

    out = net_forward(x, params)
    out = jax.block_until_ready(out)

    ref = net_reference(x, params)
    np.testing.assert_allclose(np.asarray(out), np.asarray(ref),
                               rtol=2e-3, atol=2e-3)

    print("KERNEL_OK")
</pallas_src>

<mosaic_0001>
module attributes {stable_mosaic.version = 11 : i64} {
  func.func @net_kernel(%arg0: i32, %arg1: memref<32x128xf32, #tpu.memory_space<vmem>>, %arg2: memref<192x32xbf16, #tpu.memory_space<vmem>>, %arg3: memref<192x1xf32, #tpu.memory_space<vmem>>, %arg4: memref<96x192xbf16, #tpu.memory_space<vmem>>, %arg5: memref<64x96xbf16, #tpu.memory_space<vmem>>, %arg6: memref<32x64xbf16, #tpu.memory_space<vmem>>, %arg7: memref<32x1xf32, #tpu.memory_space<vmem>>, %arg8: memref<1x1xf32, #tpu.memory_space<vmem>>, %arg9: memref<1x128xf32, #tpu.memory_space<vmem>>) attributes {dimension_semantics = [#tpu.dimension_semantics<parallel>], iteration_bounds = array<i64: 1>, scalar_prefetch = 0 : i64, scratch_operands = 0 : i64, tpu.core_type = #tpu.core_type<tc>, window_params = [{transform_indices = @transform_0, window_bounds = array<i64: 32, 128>}, {pipeline_mode = #tpu.pipeline_mode<synchronous>, transform_indices = @transform_1, window_bounds = array<i64: 192, 32>}, {pipeline_mode = #tpu.pipeline_mode<synchronous>, transform_indices = @transform_2, window_bounds = array<i64: 192, 1>}, {pipeline_mode = #tpu.pipeline_mode<synchronous>, transform_indices = @transform_3, window_bounds = array<i64: 96, 192>}, {pipeline_mode = #tpu.pipeline_mode<synchronous>, transform_indices = @transform_4, window_bounds = array<i64: 64, 96>}, {pipeline_mode = #tpu.pipeline_mode<synchronous>, transform_indices = @transform_5, window_bounds = array<i64: 32, 64>}, {pipeline_mode = #tpu.pipeline_mode<synchronous>, transform_indices = @transform_6, window_bounds = array<i64: 32, 1>}, {pipeline_mode = #tpu.pipeline_mode<synchronous>, transform_indices = @transform_7, window_bounds = array<i64: 1, 1>}, {transform_indices = @transform_8, window_bounds = array<i64: 1, 128>}]} {
    %c0 = arith.constant 0 : index
    %c0_0 = arith.constant 0 : index
    %0 = vector.load %arg1[%c0, %c0_0] : memref<32x128xf32, #tpu.memory_space<vmem>>, vector<32x128xf32>
    %1 = arith.truncf %0 : vector<32x128xf32> to vector<32x128xbf16>
    %c0_1 = arith.constant 0 : index
    %c0_2 = arith.constant 0 : index
    %2 = vector.load %arg2[%c0_1, %c0_2] : memref<192x32xbf16, #tpu.memory_space<vmem>>, vector<192x32xbf16>
    %cst = arith.constant dense<0.000000e+00> : vector<192x128xf32>
    %3 = tpu.matmul %2, %1, %cst {dimension_numbers = #tpu.dot_dimension_numbers<[1], [0], [0], [1], [0, 0, 1, 1], [], []>} : vector<192x32xbf16>, vector<32x128xbf16>, vector<192x128xf32> -> vector<192x128xf32>
    %c0_3 = arith.constant 0 : index
    %c0_4 = arith.constant 0 : index
    %4 = vector.load %arg3[%c0_3, %c0_4] : memref<192x1xf32, #tpu.memory_space<vmem>>, vector<192x1xf32>
    %5 = vector.broadcast %4 : vector<192x1xf32> to vector<192x128xf32>
    %6 = arith.addf %3, %5 : vector<192x128xf32>
    %cst_5 = arith.constant 0.000000e+00 : f32
    %7 = vector.broadcast %cst_5 : f32 to vector<192x128xf32>
    %8 = arith.cmpf ogt, %6, %7 : vector<192x128xf32>
    %cst_6 = arith.constant 0.000000e+00 : f32
    %9 = vector.broadcast %cst_6 : f32 to vector<192x128xf32>
    %10 = arith.minimumf %6, %9 : vector<192x128xf32>
    %11 = math.exp %10 : vector<192x128xf32>
    %cst_7 = arith.constant 1.000000e+00 : f32
    %12 = vector.broadcast %cst_7 : f32 to vector<192x128xf32>
    %13 = arith.subf %11, %12 : vector<192x128xf32>
    %cst_8 = arith.constant 1.67326319 : f32
    %14 = vector.broadcast %cst_8 : f32 to vector<192x128xf32>
    %15 = arith.mulf %14, %13 : vector<192x128xf32>
    %16 = arith.select %8, %6, %15 : vector<192x128xi1>, vector<192x128xf32>
    %cst_9 = arith.constant 1.05070102 : f32
    %17 = vector.broadcast %cst_9 : f32 to vector<192x128xf32>
    %18 = arith.mulf %17, %16 : vector<192x128xf32>
    %c0_10 = arith.constant 0 : index
    %c0_11 = arith.constant 0 : index
    %19 = vector.load %arg4[%c0_10, %c0_11] : memref<96x192xbf16, #tpu.memory_space<vmem>>, vector<96x192xbf16>
    %20 = arith.truncf %18 : vector<192x128xf32> to vector<192x128xbf16>
    %cst_12 = arith.constant dense<0.000000e+00> : vector<96x128xf32>
    %21 = tpu.matmul %19, %20, %cst_12 {dimension_numbers = #tpu.dot_dimension_numbers<[1], [0], [0], [1], [0, 0, 1, 1], [], []>} : vector<96x192xbf16>, vector<192x128xbf16>, vector<96x128xf32> -> vector<96x128xf32>
    %cst_13 = arith.constant 0.000000e+00 : f32
    %22 = vector.broadcast %cst_13 : f32 to vector<96x128xf32>
    %23 = arith.cmpf ogt, %21, %22 : vector<96x128xf32>
    %cst_14 = arith.constant 0.000000e+00 : f32
    %24 = vector.broadcast %cst_14 : f32 to vector<96x128xf32>
    %25 = arith.minimumf %21, %24 : vector<96x128xf32>
    %26 = math.exp %25 : vector<96x128xf32>
    %cst_15 = arith.constant 1.000000e+00 : f32
    %27 = vector.broadcast %cst_15 : f32 to vector<96x128xf32>
    %28 = arith.subf %26, %27 : vector<96x128xf32>
    %cst_16 = arith.constant 1.67326319 : f32
    %29 = vector.broadcast %cst_16 : f32 to vector<96x128xf32>
    %30 = arith.mulf %29, %28 : vector<96x128xf32>
    %31 = arith.select %23, %21, %30 : vector<96x128xi1>, vector<96x128xf32>
    %cst_17 = arith.constant 1.05070102 : f32
    %32 = vector.broadcast %cst_17 : f32 to vector<96x128xf32>
    %33 = arith.mulf %32, %31 : vector<96x128xf32>
    %c0_18 = arith.constant 0 : index
    %c0_19 = arith.constant 0 : index
    %34 = vector.load %arg5[%c0_18, %c0_19] : memref<64x96xbf16, #tpu.memory_space<vmem>>, vector<64x96xbf16>
    %35 = arith.truncf %33 : vector<96x128xf32> to vector<96x128xbf16>
    %cst_20 = arith.constant dense<0.000000e+00> : vector<64x128xf32>
    %36 = tpu.matmul %34, %35, %cst_20 {dimension_numbers = #tpu.dot_dimension_numbers<[1], [0], [0], [1], [0, 0, 1, 1], [], []>} : vector<64x96xbf16>, vector<96x128xbf16>, vector<64x128xf32> -> vector<64x128xf32>
    %cst_21 = arith.constant 0.000000e+00 : f32
    %37 = vector.broadcast %cst_21 : f32 to vector<64x128xf32>
    %38 = arith.cmpf ogt, %36, %37 : vector<64x128xf32>
    %cst_22 = arith.constant 0.000000e+00 : f32
    %39 = vector.broadcast %cst_22 : f32 to vector<64x128xf32>
    %40 = arith.minimumf %36, %39 : vector<64x128xf32>
    %41 = math.exp %40 : vector<64x128xf32>
    %cst_23 = arith.constant 1.000000e+00 : f32
    %42 = vector.broadcast %cst_23 : f32 to vector<64x128xf32>
    %43 = arith.subf %41, %42 : vector<64x128xf32>
    %cst_24 = arith.constant 1.67326319 : f32
    %44 = vector.broadcast %cst_24 : f32 to vector<64x128xf32>
    %45 = arith.mulf %44, %43 : vector<64x128xf32>
    %46 = arith.select %38, %36, %45 : vector<64x128xi1>, vector<64x128xf32>
    %cst_25 = arith.constant 1.05070102 : f32
    %47 = vector.broadcast %cst_25 : f32 to vector<64x128xf32>
    %48 = arith.mulf %47, %46 : vector<64x128xf32>
    %c0_26 = arith.constant 0 : index
    %c0_27 = arith.constant 0 : index
    %49 = vector.load %arg6[%c0_26, %c0_27] : memref<32x64xbf16, #tpu.memory_space<vmem>>, vector<32x64xbf16>
    %50 = arith.truncf %48 : vector<64x128xf32> to vector<64x128xbf16>
    %cst_28 = arith.constant dense<0.000000e+00> : vector<32x128xf32>
    %51 = tpu.matmul %49, %50, %cst_28 {dimension_numbers = #tpu.dot_dimension_numbers<[1], [0], [0], [1], [0, 0, 1, 1], [], []>} : vector<32x64xbf16>, vector<64x128xbf16>, vector<32x128xf32> -> vector<32x128xf32>
    %cst_29 = arith.constant 0.000000e+00 : f32
    %52 = vector.broadcast %cst_29 : f32 to vector<32x128xf32>
    %53 = arith.cmpf ogt, %51, %52 : vector<32x128xf32>
    %cst_30 = arith.constant 0.000000e+00 : f32
    %54 = vector.broadcast %cst_30 : f32 to vector<32x128xf32>
    %55 = arith.minimumf %51, %54 : vector<32x128xf32>
    %56 = math.exp %55 : vector<32x128xf32>
    %cst_31 = arith.constant 1.000000e+00 : f32
    %57 = vector.broadcast %cst_31 : f32 to vector<32x128xf32>
    %58 = arith.subf %56, %57 : vector<32x128xf32>
    %cst_32 = arith.constant 1.67326319 : f32
    %59 = vector.broadcast %cst_32 : f32 to vector<32x128xf32>
    %60 = arith.mulf %59, %58 : vector<32x128xf32>
    %61 = arith.select %53, %51, %60 : vector<32x128xi1>, vector<32x128xf32>
    %cst_33 = arith.constant 1.05070102 : f32
    %62 = vector.broadcast %cst_33 : f32 to vector<32x128xf32>
    %63 = arith.mulf %62, %61 : vector<32x128xf32>
    %c0_34 = arith.constant 0 : index
    %c0_35 = arith.constant 0 : index
    %64 = vector.load %arg7[%c0_34, %c0_35] : memref<32x1xf32, #tpu.memory_space<vmem>>, vector<32x1xf32>
    %65 = vector.broadcast %64 : vector<32x1xf32> to vector<32x128xf32>
    %66 = arith.mulf %63, %65 : vector<32x128xf32>
    %cst_36 = arith.constant dense<0.000000e+00> : vector<128xf32>
    %67 = vector.multi_reduction <add>, %66, %cst_36 [0] : vector<32x128xf32> to vector<128xf32>
    %68 = vector.shape_cast %67 : vector<128xf32> to vector<1x128xf32>
    %c0_37 = arith.constant 0 : index
    %c0_38 = arith.constant 0 : index
    %69 = vector.load %arg8[%c0_37, %c0_38] : memref<1x1xf32, #tpu.memory_space<vmem>>, vector<1x1xf32>
    %70 = vector.broadcast %69 : vector<1x1xf32> to vector<1x128xf32>
    %71 = arith.addf %68, %70 : vector<1x128xf32>
    %cst_39 = arith.constant 5.000000e-01 : f32
    %72 = vector.broadcast %cst_39 : f32 to vector<1x128xf32>
    %73 = arith.mulf %72, %71 : vector<1x128xf32>
    %74 = math.tanh %73 : vector<1x128xf32>
    %cst_40 = arith.constant 5.000000e-01 : f32
    %75 = vector.broadcast %cst_40 : f32 to vector<1x128xf32>
    %76 = arith.mulf %75, %74 : vector<1x128xf32>
    %cst_41 = arith.constant 5.000000e-01 : f32
    %77 = vector.broadcast %cst_41 : f32 to vector<1x128xf32>
    %78 = arith.addf %76, %77 : vector<1x128xf32>
    %c0_42 = arith.constant 0 : index
    %c0_43 = arith.constant 0 : index
    %79 = vector.load %arg9[%c0_42, %c0_43] : memref<1x128xf32, #tpu.memory_space<vmem>>, vector<1x128xf32>
    tpu.vector_store %arg9[%c0_42, %c0_43], %78 {strides = array<i32>} : memref<1x128xf32, #tpu.memory_space<vmem>>, vector<1x128xf32>,
    return
  }
  func.func @transform_0(%arg0: i32) -> (i32, i32) {
    %c0_i32 = arith.constant 0 : i32
    %c0_i32_0 = arith.constant 0 : i32
    return %c0_i32, %arg0 : i32, i32
  }
  func.func @transform_1(%arg0: i32) -> (i32, i32) {
    %c0_i32 = arith.constant 0 : i32
    %c0_i32_0 = arith.constant 0 : i32
    %c0_i32_1 = arith.constant 0 : i32
    return %c0_i32, %c0_i32_0 : i32, i32
  }
  func.func @transform_2(%arg0: i32) -> (i32, i32) {
    %c0_i32 = arith.constant 0 : i32
    %c0_i32_0 = arith.constant 0 : i32
    %c0_i32_1 = arith.constant 0 : i32
    return %c0_i32, %c0_i32_0 : i32, i32
  }
  func.func @transform_3(%arg0: i32) -> (i32, i32) {
    %c0_i32 = arith.constant 0 : i32
    %c0_i32_0 = arith.constant 0 : i32
    %c0_i32_1 = arith.constant 0 : i32
    return %c0_i32, %c0_i32_0 : i32, i32
  }
  func.func @transform_4(%arg0: i32) -> (i32, i32) {
    %c0_i32 = arith.constant 0 : i32
    %c0_i32_0 = arith.constant 0 : i32
    %c0_i32_1 = arith.constant 0 : i32
    return %c0_i32, %c0_i32_0 : i32, i32
  }
  func.func @transform_5(%arg0: i32) -> (i32, i32) {
    %c0_i32 = arith.constant 0 : i32
    %c0_i32_0 = arith.constant 0 : i32
    %c0_i32_1 = arith.constant 0 : i32
    return %c0_i32, %c0_i32_0 : i32, i32
  }
  func.func @transform_6(%arg0: i32) -> (i32, i32) {
    %c0_i32 = arith.constant 0 : i32
    %c0_i32_0 = arith.constant 0 : i32
    %c0_i32_1 = arith.constant 0 : i32
    return %c0_i32, %c0_i32_0 : i32, i32
  }
  func.func @transform_7(%arg0: i32) -> (i32, i32) {
    %c0_i32 = arith.constant 0 : i32
    %c0_i32_0 = arith.constant 0 : i32
    %c0_i32_1 = arith.constant 0 : i32
    return %c0_i32, %c0_i32_0 : i32, i32
  }
  func.func @transform_8(%arg0: i32) -> (i32, i32) {
    %c0_i32 = arith.constant 0 : i32
    %c0_i32_0 = arith.constant 0 : i32
    return %c0_i32, %arg0 : i32, i32
  }
}

</mosaic_0001>

<bundles_post_ra>
// kernel: tpu_custom_call.1
= control target key start
LH: loop header
LB: loop body
LE: loop exit
PB: predicated region body
PF: predicated region fallthrough
CT: control target
= control target key end

     0   :  { %s2084_s0 = inlined_call_operand.vmem [shape: f32[32,128], index: 0, kind: input, shape index: {}]   ;;  %s2085_s1 = inlined_call_operand.vmem [shape: bf16[192,32], index: 1, kind: input, shape index: {}]   ;;  %s2086_s2 = inlined_call_operand.vmem [shape: f32[192,1], index: 2, kind: input, shape index: {}]   ;;  %s2087_s3 = inlined_call_operand.vmem [shape: bf16[96,192], index: 3, kind: input, shape index: {}]   ;;  %s2088_s4 = inlined_call_operand.vmem [shape: bf16[64,96], index: 4, kind: input, shape index: {}]   ;;  %s2089_s5 = inlined_call_operand.vmem [shape: bf16[32,64], index: 5, kind: input, shape index: {}]   ;;  %s2090_s6 = inlined_call_operand.vmem [shape: f32[32,1], index: 6, kind: input, shape index: {}]   ;;  %s2091_s7 = inlined_call_operand.<no memory space> [shape: f32[1,1], index: 7, kind: input, shape index: {}]   ;;  %s2092_s8 = inlined_call_operand.hbm [shape: f32[1,128], index: 8, kind: output, shape index: {}]  }
   0x1   :  { %v13_v0 = vstv %s2091_s7 }
   0x2   :  { %14 = vst [vmem:[#allocation2] sm:$0x1] %v13_v0 }
   0x3   :  { %v35_v1 = vld [vmem:[%s2084_s0 + $0x10] sm:$0xff]  ;;  %v36_v2 = vld [vmem:[%s2084_s0 + $0x18] sm:$0xff]  ;;  %v33_v3 = vld [vmem:[%s2084_s0] sm:$0xff]  ;;  %vm267_vm0 = vcmask 261120   ;;  %v1599_v6 = vmov 0  }
   0x4   :  { %v38_v4 = vpack.c.bf16 %v36_v2, %v35_v1  ;;  %v34_v5 = vld [vmem:[%s2084_s0 + $0x8] sm:$0xff]  ;;  %1441 = vset.pattern.permute.xlu0 %v1599_v6  ;;  %1442 = vset.pattern.permute.xlu1 %v1599_v6  ;;  %v1443_v8 = vld [vmem:[%s2085_s1] sm:$0xff]   ;;  %v1445_v10 = vld [vmem:[%s2085_s1 + $0x10] sm:$0xff]  }
   0x5   :  { %v37_v7 = vpack.c.bf16 %v34_v5, %v33_v3  ;;  %722 = vmatprep.subr.bf16.mxu1 %v1599_v6  ;;  %1383 = vmatprep.mubr.msk.bf16.mxu0 %vm267_vm0, %v1443_v8  ;;  %v1444_v9 = vld [vmem:[%s2085_s1 + $0x8] sm:$0xff]   ;;  %v77_v11 = vld [vmem:[%s2086_s2 + $0x70] sm:$0xff]  ;;  %v78_v12 = vld [vmem:[%s2086_s2 + $0x78] sm:$0xff] }
   0x6   :  { %1379 = vmatprep.subr.bf16.mxu0 %v38_v4  ;;  %159 = vperm.xlu0 %1441, %v77_v11   ;;  %v75_v13 = vld [vmem:[%s2086_s2 + $0x60] sm:$0xff]  ;;  %v1446_v14 = vld [vmem:[%s2085_s1 + $0x18] sm:$0xff]   ;;  %v76_v16 = vld [vmem:[%s2086_s2 + $0x68] sm:$0xff] }
   0x7   :  { %1380 = vmatpush3.bf16.msra.mxu0 %v38_v4  ;;  %149 = vperm.xlu1 %1442, %v75_v13   ;;  %v1447_v15 = vld [vmem:[%s2085_s1 + $0x20] sm:$0xff]   ;;  %v73_v17 = vld [vmem:[%s2086_s2 + $0x50] sm:$0xff]  ;;  %v74_v18 = vld [vmem:[%s2086_s2 + $0x58] sm:$0xff] }
   0x8   :  { %1381 = vmatprep.subr.bf16.mxu0 %v37_v7  ;;  %v71_v19 = vld [vmem:[%s2086_s2 + $0x40] sm:$0xff]  ;;  %v1448_v20 = vld [vmem:[%s2085_s1 + $0x28] sm:$0xff]   ;;  %v1449_v21 = vld [vmem:[%s2085_s1 + $0x30] sm:$0xff]  }
   0x9   :  { %v72_v22 = vld [vmem:[%s2086_s2 + $0x48] sm:$0xff]  ;;  %v69_v23 = vld [vmem:[%s2086_s2 + $0x30] sm:$0xff]  ;;  %v70_v24 = vld [vmem:[%s2086_s2 + $0x38] sm:$0xff] }
   0xa   :  { %164 = vperm.xlu0 %1441, %v78_v12   ;;  %v67_v25 = vld [vmem:[%s2086_s2 + $0x20] sm:$0xff]  ;;  %v1450_v26 = vld [vmem:[%s2085_s1 + $0x38] sm:$0xff]  }
   0xb   :  { %1382 = vmatpush3.bf16.msra.mxu0 %v37_v7  ;;  %154 = vperm.xlu1 %1442, %v76_v16  }
   0xe   :  { %1384 = vmatmul.mubr.msk.bf16.vlgmr.msra.gmra.mxu0 %vm267_vm0, %v1444_v9  ;;  %139 = vperm.xlu0 %1441, %v73_v17  }
   0xf   :  { %1387 = vmatprep.mubr.msk.bf16.mxu0 %vm267_vm0, %v1445_v10  ;;  %144 = vperm.xlu1 %1442, %v74_v18  }
  0x12   :  { %129 = vperm.xlu0 %1441, %v71_v19  }
  0x13   :  { %134 = vperm.xlu1 %1442, %v72_v22  }
  0x16   :  { %1388 = vmatmul.mubr.msk.bf16.gmra.mxu0 %vm267_vm0, %v1446_v14  ;;  %119 = vperm.xlu0 %1441, %v69_v23  }
  0x17   :  { %1391 = vmatprep.mubr.msk.bf16.mxu0 %vm267_vm0, %v1447_v15  ;;  %124 = vperm.xlu1 %1442, %v70_v24  }
  0x1e   :  { %1392 = vmatmul.mubr.msk.bf16.gmra.mxu0 %vm267_vm0, %v1448_v20 }
  0x1f   :  { %1395 = vmatprep.mubr.msk.bf16.mxu0 %vm267_vm0, %v1449_v21 }
  0x20   :  { %15 = vsyncpa [#allocation4], 0  ;;  %v1451_v27 = vld [vmem:[%s2085_s1 + $0x40] sm:$0xff]   ;;  %109 = vperm.xlu0 %1441, %v67_v25   ;;  %v68_v28 = vld [vmem:[%s2086_s2 + $0x28] sm:$0xff]  ;;  %vm703_vm1 = vcmask 523264  }
  0x21   :  { %v65_v29 = vld [vmem:[%s2086_s2 + $0x10] sm:$0xff]  ;;  %114 = vperm.xlu1 %1442, %v68_v28   ;;  %v66_v30 = vld [vmem:[%s2086_s2 + $0x18] sm:$0xff]  ;;  %v63_v31 = vld [vmem:[%s2086_s2] sm:$0xff] }
  0x22   :  { %v1452_v32 = vld [vmem:[%s2085_s1 + $0x48] sm:$0xff]   ;;  %v1453_v33 = vld [vmem:[%s2085_s1 + $0x50] sm:$0xff]   ;;  %v86_v36 = vld [vmem:[%s2086_s2 + $0xb8] sm:$0xff] }
  0x23   :  { %v64_v34 = vld [vmem:[%s2086_s2 + $0x8] sm:$0xff]  ;;  %v85_v35 = vld [vmem:[%s2086_s2 + $0xb0] sm:$0xff]  ;;  %v83_v37 = vld [vmem:[%s2086_s2 + $0xa0] sm:$0xff] }
  0x24   :  { %99 = vperm.xlu0 %1441, %v65_v29   ;;  %v1454_v38 = vld [vmem:[%s2085_s1 + $0x58] sm:$0xff]   ;;  %v84_v39 = vld [vmem:[%s2086_s2 + $0xa8] sm:$0xff]  ;;  %v81_v40 = vld [vmem:[%s2086_s2 + $0x90] sm:$0xff] }
  0x25   :  { %104 = vperm.xlu1 %1442, %v66_v30   ;;  %v82_v41 = vld [vmem:[%s2086_s2 + $0x98] sm:$0xff]  ;;  %v79_v42 = vld [vmem:[%s2086_s2 + $0x80] sm:$0xff]  ;;  %v80_v43 = vld [vmem:[%s2086_s2 + $0x88] sm:$0xff] }
  0x26   :  { %1396 = vmatmul.mubr.msk.bf16.gmra.mxu0 %vm267_vm0, %v1450_v26  ;;  %v1180_v44 = vld [vmem:[%s2090_s6] sm:$0xff]  ;;  %v1181_v45 = vld [vmem:[%s2090_s6 + $0x8] sm:$0xff]  ;;  %v1182_v46 = vld [vmem:[%s2090_s6 + $0x10] sm:$0xff] }
  0x27   :  { %1399 = vmatprep.mubr.msk.bf16.mxu0 %vm267_vm0, %v1451_v27  ;;  %v1183_v47 = vld [vmem:[%s2090_s6 + $0x18] sm:$0xff]  ;;  %v1217_v48 = vld [vmem:[#allocation2] sm:$0x1]  ;;  %v1457_v49 = vld [vmem:[%s2087_s3 + $0x4] ss:$8 sps:$4 sm:$0xff]  }
  0x28   :  { %89 = vperm.xlu0 %1441, %v63_v31   ;;  %1307 = vmatprep.mubr.msk.bf16.mxu1 %vm703_vm1, %v1457_v49 }
  0x29   :  { %94 = vperm.xlu1 %1442, %v64_v34  }
  0x2c   :  { %199 = vperm.xlu0 %1441, %v85_v35  }
  0x2d   :  { %204 = vperm.xlu1 %1442, %v86_v36  }
  0x2e   :  { %1400 = vmatmul.mubr.msk.bf16.gmra.mxu0 %vm267_vm0, %v1452_v32 }
  0x2f   :  { %1403 = vmatprep.mubr.msk.bf16.mxu0 %vm267_vm0, %v1453_v33 }
  0x30   :  { %189 = vperm.xlu0 %1441, %v83_v37  }
  0x31   :  { %194 = vperm.xlu1 %1442, %v84_v39  }
  0x34   :  { %179 = vperm.xlu0 %1441, %v81_v40  }
  0x35   :  { %184 = vperm.xlu1 %1442, %v82_v41  }
  0x36   :  { %1404 = vmatmul.mubr.msk.bf16.gmra.mxu0 %vm267_vm0, %v1454_v38 }
  0x38   :  { %169 = vperm.xlu0 %1441, %v79_v42  }
  0x39   :  { %174 = vperm.xlu1 %1442, %v80_v43  }
  0x3c   :  { %1186 = vperm.xlu0 %1441, %v1180_v44  }
  0x3d   :  { %1191 = vperm.xlu1 %1442, %v1181_v45  }
  0x40   :  { %1196 = vperm.xlu0 %1441, %v1182_v46  }
  0x41   :  { %1201 = vperm.xlu1 %1442, %v1183_v47  }
  0x44   :  { %1220 = vperm.xlu0 %1441, %v1217_v48  }
  0x81   :  { %v160_v50 = vpop.permute.xlu0 %159 }
  0x82   :  { %v150_v51 = vpop.permute.xlu1 %149 }
  0x85   :  { %v165_v52 = vpop.permute.xlu0 %164 }
  0x86   :  { %v155_v53 = vpop.permute.xlu1 %154 }
  0x89   :  { %v140_v55 = vpop.permute.xlu0 %139 }
  0x8a   :  { %v145_v58 = vpop.permute.xlu1 %144 }
  0x8d   :  { %v130_v60 = vpop.permute.xlu0 %129 }
  0x8e   :  { %v135_v63 = vpop.permute.xlu1 %134 }
  0x91   :  { %v120_v1 = vpop.permute.xlu0 %119 }
  0x92   :  { %v125_v4 = vpop.permute.xlu1 %124 }
  0x9b   :  { %v110_v7 = vpop.permute.xlu0 %109 }
  0x9c   :  { %v115_v12 = vpop.permute.xlu1 %114 }
  0x9f   :  { %v100_v15 = vpop.permute.xlu0 %99 }
  0xa0   :  { %v105_v22 = vpop.permute.xlu1 %104 }
  0xa3   :  { %v90_v32 = vpop.permute.xlu0 %89 }
  0xa4   :  { %v95_v43 = vpop.permute.xlu1 %94 }
  0xce   :  { %v1385_v54 = vpop.f32.mrf.mxu0 }
  0xcf   :  { %v1819_v33 = vadd.f32 %v1385_v54, %v100_v15 }
  0xd0   :  { %v338_v56 = vpop.f32.mrf.mxu0 }
  0xd1   :  { %v1827_v37 = vadd.f32 %v338_v56, %v90_v32  ;;  %v459_v47 = vmin.f32 %v1819_v33, 0.0  ;;  %vm435_vm15 = vcmp.gt.f32.partialorder %v1819_v33, 0.0 }
  0xd2   :  { %v1386_v57 = vpop.f32.mrf.mxu0 }
  0xd3   :  { %v1834_v44 = vadd.f32 %v1386_v57, %v105_v22 }
  0xd4   :  { %v341_v59 = vpop.f32.mrf.mxu0 }
  0xd5   :  { %vm436_vm14 = vcmp.gt.f32.partialorder %v1834_v44, 0.0 }
  0xd6   :  { %v1389_v61 = vpop.f32.mrf.mxu0 }
  0xd7   :  { %v1830_v39 = vadd.f32 %v1389_v61, %v120_v1  ;;  %v200_v1 = vpop.permute.xlu0 %199 }
  0xd8   :  { %v354_v62 = vpop.f32.mrf.mxu0 }
  0xd9   :  { %v1848_v56 = vadd.f32 %v354_v62, %v110_v7  ;;  %vm439_vm11 = vcmp.gt.f32.partialorder %v1830_v39, 0.0 }
  0xda   :  { %v1390_v0 = vpop.f32.mrf.mxu0 }
  0xdb   :  { %v1800_v9 = vadd.f32 %v1390_v0, %v125_v4  ;;  %v205_v4 = vpop.permute.xlu1 %204  ;;  %vm437_vm13 = vcmp.gt.f32.partialorder %v1848_v56, 0.0 }
  0xdc   :  { %v357_v2 = vpop.f32.mrf.mxu0 }
  0xdd   :  { %v464_v14 = vmin.f32 %v1800_v9, 0.0  ;;  %v1839_v48 = vadd.f32 %v357_v2, %v115_v12  ;;  %vm440_vm10 = vcmp.gt.f32.partialorder %v1800_v9, 0.0 }
  0xde   :  { %v1393_v3 = vpop.f32.mrf.mxu0 }
  0xdf   :  { %v1805_v16 = vadd.f32 %v1393_v3, %v140_v55  ;;  %v495_v23 = vmul.f32 1.442695, %v464_v14  ;;  %v463_v55 = vmin.f32 %v1830_v39, 0.0  ;;  %v462_v0 = vmin.f32 %v1839_v48, 0.0 }
  0xe0   :  { %v370_v5 = vpop.f32.mrf.mxu0  ;;  %vm438_vm12 = vcmp.gt.f32.partialorder %v1839_v48, 0.0 }
  0xe1   :  { %v467_v26 = vmin.f32 %v1805_v16, 0.0  ;;  %v1816_v29 = vadd.f32 %v370_v5, %v130_v60  ;;  %1479 = vpow2.f32 %v495_v23  ;;  %v460_v60 = vmin.f32 %v1834_v44, 0.0 }
  0xe2   :  { %v1394_v8 = vpop.f32.mrf.mxu0  ;;  %v493_v62 = vmul.f32 1.442695, %v463_v55  ;;  %v461_v5 = vmin.f32 %v1848_v56, 0.0  ;;  %vm443_vm7 = vcmp.gt.f32.partialorder %v1805_v16, 0.0 }
  0xe3   :  { %v1802_v10 = vadd.f32 %v1394_v8, %v145_v58  ;;  %v501_v40 = vmul.f32 1.442695, %v467_v26  ;;  %v465_v45 = vmin.f32 %v1816_v29, 0.0  ;;  %v487_v8 = vmul.f32 1.442695, %v460_v60 }
  0xe4   :  { %v373_v11 = vpop.f32.mrf.mxu0  ;;  %v489_v14 = vmul.f32 1.442695, %v461_v5  ;;  %vm441_vm9 = vcmp.gt.f32.partialorder %v1816_v29, 0.0 }
  0xe5   :  { %v468_v17 = vmin.f32 %v1802_v10, 0.0  ;;  %v1812_v24 = vadd.f32 %v373_v11, %v135_v63  ;;  %v497_v61 = vmul.f32 1.442695, %v465_v45  ;;  %v485_v63 = vmul.f32 1.442695, %v459_v47 }
  0xe6   :  { %v1397_v13 = vpop.f32.mrf.mxu0  ;;  %v491_v11 = vmul.f32 1.442695, %v462_v0  ;;  %vm444_vm4 = vcmp.gt.f32.partialorder %v1802_v10, 0.0 }
  0xe7   :  { %v1808_v19 = vadd.f32 %v1397_v13, %v160_v50  ;;  %v503_v27 = vmul.f32 1.442695, %v468_v17  ;;  %v466_v38 = vmin.f32 %v1812_v24, 0.0  ;;  %vm442_vm8 = vcmp.gt.f32.partialorder %v1812_v24, 0.0 }
  0xe8   :  { %v386_v18 = vpop.f32.mrf.mxu0 }
  0xe9   :  { %v1810_v20 = vadd.f32 %v386_v18, %v150_v51  ;;  %v471_v25 = vmin.f32 %v1808_v19, 0.0  ;;  %1481 = vpow2.f32 %v503_v27  ;;  %v457_v51 = vmin.f32 %v1827_v37, 0.0  ;;  %v190_v18 = vpop.permute.xlu0 %189 }
  0xea   :  { %v1398_v21 = vpop.f32.mrf.mxu0  ;;  %vm447_vm2 = vcmp.gt.f32.partialorder %v1808_v19, 0.0 }
  0xeb   :  { %v509_v30 = vmul.f32 1.442695, %v471_v25  ;;  %v469_v31 = vmin.f32 %v1810_v20, 0.0  ;;  %v1821_v34 = vadd.f32 %v1398_v21, %v165_v52  ;;  %v1845_v52 = vadd.f32 %v341_v59, %v95_v43  ;;  %v195_v21 = vpop.permute.xlu1 %194 }
  0xec   :  { %v389_v28 = vpop.f32.mrf.mxu0  ;;  %v481_v2 = vmul.f32 1.442695, %v457_v51  ;;  %vm445_vm3 = vcmp.gt.f32.partialorder %v1810_v20, 0.0 }
  0xed   :  { %v1823_v35 = vadd.f32 %v389_v28, %v155_v53  ;;  %v505_v41 = vmul.f32 1.442695, %v469_v31  ;;  %1483 = vpow2.f32 %v509_v30  ;;  %v472_v46 = vmin.f32 %v1821_v34, 0.0  ;;  %v180_v43 = vpop.permute.xlu0 %179 }
  0xee   :  { %v1825_v36 = vpop.f32.mrf.mxu0  ;;  %v499_v53 = vmul.f32 1.442695, %v466_v38  ;;  %v458_v3 = vmin.f32 %v1845_v52, 0.0  ;;  %v1480_v13 = vpop.eup %1479  ;;  %vm448_vm5 = vcmp.gt.f32.partialorder %v1821_v34, 0.0  ;;  %vm434_vm0 = vcmp.gt.f32.partialorder %v1845_v52, 0.0 }
  0xef   :  { %1485 = vpow2.f32 %v505_v41  ;;  %v470_v49 = vmin.f32 %v1823_v35, 0.0  ;;  %v511_v54 = vmul.f32 1.442695, %v472_v46  ;;  %v1862_v32 = vadd.f32 -1.0, %v1480_v13  ;;  %v185_v45 = vpop.permute.xlu1 %184 }
  0xf0   :  { %v1832_v42 = vpop.f32.mrf.mxu0  ;;  %1487 = vpow2.f32 %v501_v40  ;;  %v483_v12 = vmul.f32 1.442695, %v458_v3  ;;  %vm446_vm6 = vcmp.gt.f32.partialorder %v1823_v35, 0.0  ;;  %v1872_v55 = vadd.f32 %v1825_v36, %v180_v43 }
  0xf1   :  { %v507_v57 = vmul.f32 1.442695, %v470_v49  ;;  %1489 = vpow2.f32 %v511_v54 }
  0xf2   :  { %v1842_v50 = vpop.f32.mrf.mxu0 }
  0xf3   :  { %1491 = vpow2.f32 %v507_v57  ;;  %v1879_v3 = vadd.f32 %v1842_v50, %v185_v45 }
  0xf4   :  { %v1850_v58 = vpop.f32.mrf.mxu0  ;;  %1493 = vpow2.f32 %v499_v53 }
  0xf5   :  { %1495 = vpow2.f32 %v497_v61 }
  0xf6   :  { %v1405_v59 = vpop.f32.mrf.mxu0  ;;  %1497 = vpow2.f32 %v485_v63  ;;  %v1482_v17 = vpop.eup %1481 }
  0xf7   :  { %1499 = vpow2.f32 %v481_v2  ;;  %v1860_v30 = vadd.f32 %v1405_v59, %v200_v1  ;;  %v1282_v38 = vadd.f32 -1.0, %v1482_v17  ;;  %v175_v17 = vpop.permute.xlu1 %174 }
  0xf8   :  { %v418_v7 = vpop.f32.mrf.mxu0  ;;  %1501 = vpow2.f32 %v493_v62 }
  0xf9   :  { %1503 = vpow2.f32 %v487_v8  ;;  %v479_v61 = vmin.f32 %v1860_v30, 0.0  ;;  %v1875_v63 = vadd.f32 %v418_v7, %v190_v18  ;;  %v564_v1 = vmul.f32 1.6732632, %v1282_v38 }
  0xfa   :  { %v1406_v15 = vpop.f32.mrf.mxu0  ;;  %v1484_v22 = vpop.eup %1483  ;;  %1505 = vpow2.f32 %v491_v11 }
  0xfb   :  { %1507 = vpow2.f32 %v483_v12  ;;  %v1856_v25 = vadd.f32 %v1406_v15, %v205_v4  ;;  %v1285_v40 = vadd.f32 -1.0, %v1484_v22  ;;  %v477_v22 = vmin.f32 %v1875_v63, 0.0 }
  0xfc   :  { %v1486_v23 = vpop.eup %1485  ;;  %1509 = vpow2.f32 %v489_v14  ;;  %v421_v26 = vpop.f32.mrf.mxu0  ;;  %v588_v38 = vsel %vm444_vm4, %v1802_v10, %v564_v1  ;;  %vm455_vm4 = vcmp.gt.f32.partialorder %v1860_v30, 0.0 }
  0xfd   :  { %v1488_v27 = vpop.eup %1487  ;;  %v1283_v28 = vadd.f32 -1.0, %v1486_v23  ;;  %v480_v46 = vmin.f32 %v1856_v25, 0.0  ;;  %v1868_v47 = vadd.f32 %v421_v26, %v195_v21  ;;  %v567_v57 = vmul.f32 1.6732632, %v1285_v40 }
  0xfe   :  { %v1490_v31 = vpop.eup %1489  ;;  %v1281_v53 = vadd.f32 -1.0, %v1488_v27  ;;  %v525_v21 = vmul.f32 1.442695, %v479_v61  ;;  %v476_v26 = vmin.f32 %v1879_v3, 0.0  ;;  %v1901_v27 = vadd.f32 %v1850_v58, %v175_v17 }
  0xff   :  { %v1286_v49 = vadd.f32 -1.0, %v1490_v31  ;;  %v565_v60 = vmul.f32 1.6732632, %v1283_v28  ;;  %v591_v36 = vsel %vm447_vm2, %v1808_v19, %v567_v57  ;;  %v527_v5 = vmul.f32 1.442695, %v480_v46  ;;  %v170_v31 = vpop.permute.xlu0 %169 }
 0x100   :  { %v1492_v41 = vpop.eup %1491  ;;  %v478_v7 = vmin.f32 %v1868_v47, 0.0  ;;  %v563_v12 = vmul.f32 1.6732632, %v1281_v53  ;;  %v615_v13 = vmul.f32 1.050701, %v591_v36  ;;  %v475_v46 = vmin.f32 %v1872_v55, 0.0 }
 0x101   :  { %v1494_v51 = vpop.eup %1493  ;;  %v1284_v54 = vadd.f32 -1.0, %v1492_v41  ;;  %v568_v0 = vmul.f32 1.6732632, %v1286_v49  ;;  %v589_v18 = vsel %vm445_vm3, %v1810_v20, %v565_v60  ;;  %1511 = vpow2.f32 %v527_v5 }
 0x102   :  { %v1496_v59 = vpop.eup %1495  ;;  %v1280_v62 = vadd.f32 -1.0, %v1494_v51  ;;  %v523_v20 = vmul.f32 1.442695, %v478_v7  ;;  %v613_v45 = vmul.f32 1.050701, %v589_v18  ;;  %v1908_v49 = vadd.f32 %v1832_v42, %v170_v31 }
 0x103   :  { %v566_v2 = vmul.f32 1.6732632, %v1284_v54  ;;  %v1884_v4 = vpop.eup %1497  ;;  %v592_v8 = vsel %vm448_vm5, %v1821_v34, %v568_v0  ;;  %v1279_v15 = vadd.f32 -1.0, %v1496_v59  ;;  %v587_v51 = vsel %vm443_vm7, %v1805_v16, %v563_v12 }
 0x104   :  { %v1890_v11 = vpop.eup %1499  ;;  %v616_v14 = vmul.f32 1.050701, %v592_v8  ;;  %v562_v40 = vmul.f32 1.6732632, %v1280_v62  ;;  %1513 = vpow2.f32 %v525_v21  ;;  %v521_v10 = vmul.f32 1.442695, %v477_v22 }
 0x105   :  { %v590_v50 = vsel %vm446_vm6, %v1823_v35, %v566_v2  ;;  %v1502_v19 = vpop.eup %1501  ;;  %v561_v53 = vmul.f32 1.6732632, %v1279_v15  ;;  %v560_v54 = vmul.f32 1.6732632, %v1862_v32  ;;  %v612_v60 = vmul.f32 1.050701, %v588_v38 }
 0x106   :  { %v1504_v34 = vpop.eup %1503  ;;  %v614_v23 = vmul.f32 1.050701, %v590_v50  ;;  %v644_v35 = vpack.c.bf16 %v616_v14, %v615_v13  ;;  %v1277_v43 = vadd.f32 -1.0, %v1502_v19  ;;  %v586_v42 = vsel %vm442_vm8, %v1812_v24, %v562_v40 }
 0x107   :  { %v1506_v28 = vpop.eup %1505  ;;  %v519_v0 = vmul.f32 1.442695, %v476_v26  ;;  %v474_v59 = vmin.f32 %v1901_v27, 0.0  ;;  %1515 = vpow2.f32 %v523_v20  ;;  %v611_v2 = vmul.f32 1.050701, %v587_v51 }
 0x108   :  { %v1508_v41 = vpop.eup %1507  ;;  %723 = vmatpush1.bf16.msra.mxu1 %v644_v35  ;;  %v1276_v57 = vadd.f32 -1.0, %v1506_v28  ;;  %v643_v61 = vpack.c.bf16 %v614_v23, %v613_v45  ;;  %v559_v1 = vmul.f32 1.6732632, %v1277_v43  ;;  %v585_v36 = vsel %vm441_vm9, %v1816_v29, %v561_v53 }
 0x109   :  { %v1510_v58 = vpop.eup %1509  ;;  %724 = vmatprep.subr.bf16.mxu1 %v1599_v6  ;;  %v517_v32 = vmul.f32 1.442695, %v475_v46  ;;  %v473_v62 = vmin.f32 %v1908_v49, 0.0  ;;  %1517 = vpow2.f32 %v521_v10  ;;  %v1274_v5 = vadd.f32 -1.0, %v1504_v34 }
 0x10a   :  { %v1275_v16 = vadd.f32 -1.0, %v1510_v58  ;;  %v610_v24 = vmul.f32 1.050701, %v586_v42  ;;  %v642_v7 = vpack.c.bf16 %v612_v60, %v611_v2  ;;  %v584_v8 = vsel %vm440_vm10, %v1800_v9, %v560_v54 }
 0x10b   :  { %v558_v12 = vmul.f32 1.6732632, %v1276_v57  ;;  %1519 = vpow2.f32 %v519_v0  ;;  %v515_v50 = vmul.f32 1.442695, %v474_v59  ;;  %v1273_v13 = vadd.f32 -1.0, %v1884_v4 }
 0x10c   :  { %725 = vmatpush1.bf16.msra.mxu1 %v643_v61  ;;  %v609_v29 = vmul.f32 1.050701, %v585_v36  ;;  %v583_v14 = vsel %vm439_vm11, %v1830_v39, %v559_v1  ;;  %v557_v19 = vmul.f32 1.6732632, %v1275_v16  ;;  %1521 = vpow2.f32 %v517_v32 }
 0x10d   :  { %726 = vmatprep.subr.bf16.mxu1 %v1599_v6  ;;  %v513_v15 = vmul.f32 1.442695, %v473_v62  ;;  %v608_v17 = vmul.f32 1.050701, %v584_v8  ;;  %v556_v18 = vmul.f32 1.6732632, %v1274_v5  ;;  %v582_v22 = vsel %vm438_vm12, %v1839_v48, %v558_v12 }
 0x10e   :  { %v641_v9 = vpack.c.bf16 %v610_v24, %v609_v29  ;;  %v1272_v21 = vadd.f32 -1.0, %v1508_v41  ;;  %1523 = vpow2.f32 %v515_v50  ;;  %v1512_v4 = vpop.eup %1511  ;;  %v607_v34 = vmul.f32 1.050701, %v583_v14 }
 0x10f   :  { %v555_v39 = vmul.f32 1.6732632, %v1273_v13  ;;  %v1271_v23 = vadd.f32 -1.0, %v1890_v11  ;;  %v581_v26 = vsel %vm437_vm13, %v1848_v56, %v557_v19  ;;  %1525 = vpow2.f32 %v513_v15 }
 0x110   :  { %727 = vmatpush1.bf16.msra.mxu1 %v642_v7  ;;  %v606_v28 = vmul.f32 1.050701, %v582_v22  ;;  %v640_v31 = vpack.c.bf16 %v608_v17, %v607_v34  ;;  %v580_v48 = vsel %vm436_vm14, %v1834_v44, %v556_v18  ;;  %v554_v38 = vmul.f32 1.6732632, %v1272_v21 }
 0x111   :  { %728 = vmatprep.subr.bf16.mxu1 %v1599_v6  ;;  %v1514_v35 = vpop.eup %1513  ;;  %v1294_v40 = vadd.f32 -1.0, %v1512_v4  ;;  %v605_v41 = vmul.f32 1.050701, %v581_v26  ;;  %v579_v11 = vsel %vm435_vm15, %v1819_v33, %v555_v39  ;;  %v553_v56 = vmul.f32 1.6732632, %v1271_v23 }
 0x112   :  { %v1293_v43 = vadd.f32 -1.0, %v1514_v35  ;;  %v604_v46 = vmul.f32 1.050701, %v580_v48  ;;  %v578_v44 = vsel %vm434_vm0, %v1845_v52, %v554_v38  ;;  %v603_v54 = vmul.f32 1.050701, %v579_v11 }
 0x113   :  { %v639_v58 = vpack.c.bf16 %v606_v28, %v605_v41  ;;  %v576_v51 = vmul.f32 1.6732632, %v1294_v40  ;;  %vm433_vm2 = vcmp.gt.f32.partialorder %v1827_v37, 0.0  ;;  %v602_v42 = vmul.f32 1.050701, %v578_v44 }
 0x114   :  { %729 = vmatpush1.bf16.msra.mxu1 %v641_v9  ;;  %v1516_v20 = vpop.eup %1515  ;;  %v577_v33 = vsel %vm433_vm2, %v1827_v37, %v553_v56  ;;  %v575_v57 = vmul.f32 1.6732632, %v1293_v43  ;;  %vm456_vm3 = vcmp.gt.f32.partialorder %v1856_v25, 0.0  ;;  %v638_v0 = vpack.c.bf16 %v604_v46, %v603_v54  ;;  %v1455_v23 = vld [vmem:[%s2087_s3] ss:$8 sps:$4 sm:$0xff]  }
 0x115   :  { %730 = vmatprep.subr.bf16.mxu1 %v1599_v6  ;;  %v1292_v53 = vadd.f32 -1.0, %v1516_v20  ;;  %v600_v52 = vsel %vm456_vm3, %v1856_v25, %v576_v51  ;;  %v601_v2 = vmul.f32 1.050701, %v577_v33  ;;  %vm454_vm5 = vcmp.gt.f32.partialorder %v1868_v47, 0.0  ;;  %v1463_v26 = vld [vmem:[%s2087_s3 + $0x20] ss:$8 sps:$4 sm:$0xff]  }
 0x116   :  { %v1518_v45 = vpop.eup %1517  ;;  %v599_v37 = vsel %vm455_vm4, %v1860_v30, %v575_v57  ;;  %v624_v5 = vmul.f32 1.050701, %v600_v52  ;;  %vm453_vm6 = vcmp.gt.f32.partialorder %v1875_v63, 0.0  ;;  %vm452_vm7 = vcmp.gt.f32.partialorder %v1879_v3, 0.0  ;;  %v1464_v35 = vld [vmem:[%s2087_s3 + $0x34] ss:$8 sps:$4 sm:$0xff]  }
 0x117   :  { %v1291_v60 = vadd.f32 -1.0, %v1518_v45  ;;  %v574_v1 = vmul.f32 1.6732632, %v1292_v53  ;;  %v637_v24 = vpack.c.bf16 %v602_v42, %v601_v2  ;;  %v623_v12 = vmul.f32 1.050701, %v599_v37  ;;  %v1473_v20 = vld [vmem:[%s2088_s4] sm:$0xff]  }
 0x118   :  { %731 = vmatpush1.bf16.msra.mxu1 %v640_v31  ;;  %v1520_v10 = vpop.eup %1519  ;;  %vm451_vm8 = vcmp.gt.f32.partialorder %v1872_v55, 0.0  ;;  %vm450_vm9 = vcmp.gt.f32.partialorder %v1901_v27, 0.0  ;;  %vm449_vm10 = vcmp.gt.f32.partialorder %v1908_v49, 0.0  ;;  %v1466_v28 = vld [vmem:[%s2087_s3 + $0x30] ss:$8 sps:$4 sm:$0xff]   ;;  %vm933_vm11 = vcmask 785408  }
 0x119   :  { %732 = vmatprep.subr.bf16.mxu1 %v1599_v6  ;;  %v1522_v61 = vpop.eup %1521  ;;  %v1290_v59 = vadd.f32 -1.0, %v1520_v10  ;;  %v573_v32 = vmul.f32 1.6732632, %v1291_v60  ;;  %v598_v25 = vsel %vm454_vm5, %v1868_v47, %v574_v1  ;;  %v648_v14 = vpack.c.bf16 %v624_v5, %v623_v12  ;;  %v1467_v31 = vld [vmem:[%s2087_s3 + $0x44] ss:$8 sps:$4 sm:$0xff]   ;;  %1419 = vmatprep.mubr.msk.bf16.mxu0 %vm933_vm11, %v1473_v20 }
 0x11a   :  { %v1289_v36 = vadd.f32 -1.0, %v1522_v61  ;;  %v622_v29 = vmul.f32 1.050701, %v598_v25  ;;  %v1469_v48 = vld [vmem:[%s2087_s3 + $0x40] ss:$8 sps:$4 sm:$0xff]  }
 0x11b   :  { %v1524_v16 = vpop.eup %1523  ;;  %v572_v7 = vmul.f32 1.6732632, %v1290_v59  ;;  %v597_v30 = vsel %vm453_vm6, %v1875_v63, %v573_v32  ;;  %v1470_v38 = vld [vmem:[%s2087_s3 + $0x54] ss:$8 sps:$4 sm:$0xff]   ;;  %v1472_v40 = vld [vmem:[%s2087_s3 + $0x50] ss:$8 sps:$4 sm:$0xff]  }
 0x11c   :  { %733 = vmatpush1.bf16.msra.mxu1 %v639_v58  ;;  %v1526_v62 = vpop.eup %1525  ;;  %v1288_v8 = vadd.f32 -1.0, %v1524_v16  ;;  %v571_v50 = vmul.f32 1.6732632, %v1289_v36  ;;  %v621_v47 = vmul.f32 1.050701, %v597_v30 }
 0x11d   :  { %734 = vmatprep.subr.bf16.mxu1 %v1599_v6  ;;  %v1287_v13 = vadd.f32 -1.0, %v1526_v62  ;;  %v596_v19 = vsel %vm452_vm7, %v1879_v3, %v572_v7 }
 0x11e   :  { %v570_v15 = vmul.f32 1.6732632, %v1288_v8  ;;  %v595_v17 = vsel %vm451_vm8, %v1872_v55, %v571_v50  ;;  %v620_v18 = vmul.f32 1.050701, %v596_v19  ;;  %v647_v63 = vpack.c.bf16 %v622_v29, %v621_v47 }
 0x11f   :  { %v569_v9 = vmul.f32 1.6732632, %v1287_v13  ;;  %v619_v22 = vmul.f32 1.050701, %v595_v17 }
 0x120   :  { %735 = vmatpush1.bf16.msra.mxu1 %v638_v0  ;;  %v594_v21 = vsel %vm450_vm9, %v1901_v27, %v570_v15  ;;  %v1458_v27 = vld [vmem:[%s2087_s3 + $0x14] ss:$8 sps:$4 sm:$0xff]  }
 0x121   :  { %736 = vmatprep.subr.bf16.mxu1 %v1599_v6  ;;  %v593_v3 = vsel %vm449_vm10, %v1908_v49, %v569_v9  ;;  %v618_v4 = vmul.f32 1.050701, %v594_v21  ;;  %v646_v34 = vpack.c.bf16 %v620_v18, %v619_v22  ;;  %v1460_v49 = vld [vmem:[%s2087_s3 + $0x10] ss:$8 sps:$4 sm:$0xff]  }
 0x122   :  { %v617_v55 = vmul.f32 1.050701, %v593_v3 }
 0x124   :  { %737 = vmatpush1.bf16.msra.mxu1 %v637_v24  ;;  %v645_v39 = vpack.c.bf16 %v618_v4, %v617_v55 }
 0x125   :  { %746 = vmatprep.subr.bf16.mxu1 %v1599_v6 }
 0x128   :  { %747 = vmatpush2.bf16.msra.mxu1 %v648_v14 }
 0x129   :  { %748 = vmatprep.subr.bf16.mxu1 %v1599_v6 }
 0x12c   :  { %749 = vmatpush2.bf16.msra.mxu1 %v647_v63 }
 0x12d   :  { %750 = vmatprep.subr.bf16.mxu1 %v1599_v6 }
 0x130   :  { %751 = vmatpush2.bf16.msra.mxu1 %v646_v34 }
 0x131   :  { %752 = vmatprep.subr.bf16.mxu1 %v1599_v6  ;;  %v1461_v6 = vld [vmem:[%s2087_s3 + $0x24] ss:$8 sps:$4 sm:$0xff]  }
 0x134   :  { %753 = vmatpush2.bf16.msra.mxu1 %v645_v39 }
 0x137   :  { %755 = vmatmul.mubr.bf16.vlgmr.msra.gmra.mxu1 %v1455_v23 }
 0x138   :  { %1308 = vmatprep.mubr.msk.bf16.mxu1 %vm703_vm1, %v1458_v27 }
 0x13f   :  { %763 = vmatmul.mubr.bf16.gmra.mxu1 %v1460_v49 }
 0x140   :  { %1309 = vmatprep.mubr.msk.bf16.mxu1 %vm703_vm1, %v1461_v6 }
 0x147   :  { %771 = vmatmul.mubr.bf16.gmra.mxu1 %v1463_v26 }
 0x148   :  { %1310 = vmatprep.mubr.msk.bf16.mxu1 %vm703_vm1, %v1464_v35 }
 0x14f   :  { %779 = vmatmul.mubr.bf16.gmra.mxu1 %v1466_v28 }
 0x150   :  { %1311 = vmatprep.mubr.msk.bf16.mxu1 %vm703_vm1, %v1467_v31 }
 0x157   :  { %787 = vmatmul.mubr.bf16.gmra.mxu1 %v1469_v48 }
 0x158   :  { %1312 = vmatprep.mubr.msk.bf16.mxu1 %vm703_vm1, %v1470_v38 }
 0x15f   :  { %795 = vmatmul.mubr.bf16.gmra.mxu1 %v1472_v40 }
 0x1f7   :  { %v756_v41 = vpop.f32.mrf.mxu1 }
 0x1f8   :  { %v815_v11 = vmin.f32 %v756_v41, 0.0  ;;  %vm803_vm12 = vcmp.gt.f32.partialorder %v756_v41, 0.0 }
 0x1f9   :  { %v758_v56 = vpop.f32.mrf.mxu1 }
 0x1fa   :  { %v827_v43 = vmul.f32 1.442695, %v815_v11 }
 0x1fb   :  { %v759_v45 = vpop.f32.mrf.mxu1 }
 0x1fc   :  { %1527 = vpow2.f32 %v827_v43  ;;  %v816_v46 = vmin.f32 %v759_v45, 0.0  ;;  %vm804_vm13 = vcmp.gt.f32.partialorder %v759_v45, 0.0 }
 0x1fd   :  { %v761_v58 = vpop.f32.mrf.mxu1 }
 0x1fe   :  { %v829_v44 = vmul.f32 1.442695, %v816_v46 }
 0x1ff   :  { %v764_v51 = vpop.f32.mrf.mxu1 }
 0x200   :  { %1529 = vpow2.f32 %v829_v44  ;;  %v817_v53 = vmin.f32 %v764_v51, 0.0  ;;  %vm805_vm14 = vcmp.gt.f32.partialorder %v764_v51, 0.0 }
 0x201   :  { %v766_v10 = vpop.f32.mrf.mxu1 }
 0x202   :  { %v831_v54 = vmul.f32 1.442695, %v817_v53 }
 0x203   :  { %v767_v33 = vpop.f32.mrf.mxu1 }
 0x204   :  { %1531 = vpow2.f32 %v831_v54  ;;  %v818_v57 = vmin.f32 %v767_v33, 0.0  ;;  %vm806_vm15 = vcmp.gt.f32.partialorder %v767_v33, 0.0 }
 0x205   :  { %v769_v60 = vpop.f32.mrf.mxu1 }
 0x206   :  { %v833_v61 = vmul.f32 1.442695, %v818_v57 }
 0x207   :  { %v2008_v42 = vpop.f32.mrf.mxu1 }
 0x208   :  { %1533 = vpow2.f32 %v833_v61  ;;  %v819_v38 = vmin.f32 %v2008_v42, 0.0  ;;  %vm807_vm8 = vcmp.gt.f32.partialorder %v2008_v42, 0.0 }
 0x209   :  { %v1528_v0 = vpop.eup %1527  ;;  %v774_v59 = vpop.f32.mrf.mxu1 }
 0x20a   :  { %v1313_v52 = vadd.f32 -1.0, %v1528_v0 }
 0x20b   :  { %v2010_v1 = vpop.f32.mrf.mxu1 }
 0x20c   :  { %v863_v16 = vmul.f32 1.6732632, %v1313_v52  ;;  %v820_v26 = vmin.f32 %v2010_v1, 0.0  ;;  %vm808_vm7 = vcmp.gt.f32.partialorder %v2010_v1, 0.0 }
 0x20d   :  { %v1530_v2 = vpop.eup %1529  ;;  %v777_v36 = vpop.f32.mrf.mxu1 }
 0x20e   :  { %v1314_v37 = vadd.f32 -1.0, %v1530_v2  ;;  %v875_v62 = vsel %vm803_vm12, %v756_v41, %v863_v16  ;;  %v837_v41 = vmul.f32 1.442695, %v820_v26 }
 0x20f   :  { %v2012_v32 = vpop.f32.mrf.mxu1  ;;  %v887_v12 = vmul.f32 1.050701, %v875_v62 }
 0x210   :  { %v864_v5 = vmul.f32 1.6732632, %v1314_v37  ;;  %v821_v27 = vmin.f32 %v2012_v32, 0.0  ;;  %vm809_vm6 = vcmp.gt.f32.partialorder %v2012_v32, 0.0 }
 0x211   :  { %v1532_v24 = vpop.eup %1531  ;;  %v782_v7 = vpop.f32.mrf.mxu1 }
 0x212   :  { %v876_v8 = vsel %vm804_vm13, %v759_v45, %v864_v5  ;;  %v1315_v25 = vadd.f32 -1.0, %v1532_v24  ;;  %v839_v40 = vmul.f32 1.442695, %v821_v27  ;;  %v835_v45 = vmul.f32 1.442695, %v819_v38 }
 0x213   :  { %v888_v50 = vmul.f32 1.050701, %v876_v8  ;;  %v2014_v13 = vpop.f32.mrf.mxu1 }
 0x214   :  { %v865_v30 = vmul.f32 1.6732632, %v1315_v25  ;;  %v822_v4 = vmin.f32 %v2014_v13, 0.0  ;;  %vm810_vm3 = vcmp.gt.f32.partialorder %v2014_v13, 0.0 }
 0x215   :  { %v1534_v29 = vpop.eup %1533  ;;  %v785_v14 = vpop.f32.mrf.mxu1  ;;  %v2016_v19 = vpack.c.bf16 %v888_v50, %v887_v12 }
 0x216   :  { %v1316_v15 = vadd.f32 -1.0, %v1534_v29  ;;  %v877_v17 = vsel %vm805_vm14, %v764_v51, %v865_v30  ;;  %v841_v35 = vmul.f32 1.442695, %v822_v4 }
 0x217   :  { %v2018_v47 = vpop.f32.mrf.mxu1  ;;  %v889_v22 = vmul.f32 1.050701, %v877_v17 }
 0x218   :  { %v866_v9 = vmul.f32 1.6732632, %v1316_v15  ;;  %v823_v21 = vmin.f32 %v2018_v47, 0.0  ;;  %vm811_vm4 = vcmp.gt.f32.partialorder %v2018_v47, 0.0 }
 0x219   :  { %v790_v18 = vpop.f32.mrf.mxu1 }
 0x21a   :  { %v878_v63 = vsel %vm806_vm15, %v767_v33, %v866_v9  ;;  %v843_v49 = vmul.f32 1.442695, %v823_v21 }
 0x21b   :  { %v890_v3 = vmul.f32 1.050701, %v878_v63  ;;  %v791_v34 = vpop.f32.mrf.mxu1 }
 0x21c   :  { %v824_v55 = vmin.f32 %v791_v34, 0.0  ;;  %vm812_vm0 = vcmp.gt.f32.partialorder %v791_v34, 0.0 }
 0x21d   :  { %v793_v39 = vpop.f32.mrf.mxu1  ;;  %v2022_v23 = vpack.c.bf16 %v890_v3, %v889_v22 }
 0x21e   :  { %v845_v6 = vmul.f32 1.442695, %v824_v55 }
 0x21f   :  { %v796_v28 = vpop.f32.mrf.mxu1 }
 0x220   :  { %1535 = vpow2.f32 %v845_v6  ;;  %v825_v31 = vmin.f32 %v796_v28, 0.0  ;;  %vm813_vm2 = vcmp.gt.f32.partialorder %v796_v28, 0.0 }
 0x221   :  { %v798_v48 = vpop.f32.mrf.mxu1  ;;  %1537 = vpow2.f32 %v843_v49  ;;  %v1477_v49 = vld [vmem:[%s2089_s5] sm:$0xff]  }
 0x222   :  { %v847_v20 = vmul.f32 1.442695, %v825_v31  ;;  %1539 = vpow2.f32 %v841_v35 }
 0x223   :  { %v799_v11 = vpop.f32.mrf.mxu1 }
 0x224   :  { %1541 = vpow2.f32 %v847_v20  ;;  %v826_v56 = vmin.f32 %v799_v11, 0.0  ;;  %vm814_vm5 = vcmp.gt.f32.partialorder %v799_v11, 0.0 }
 0x225   :  { %v801_v43 = vpop.f32.mrf.mxu1  ;;  %1543 = vpow2.f32 %v839_v40 }
 0x226   :  { %v849_v46 = vmul.f32 1.442695, %v826_v56  ;;  %1545 = vpow2.f32 %v837_v41 }
 0x228   :  { %1547 = vpow2.f32 %v849_v46 }
 0x229   :  { %1549 = vpow2.f32 %v835_v45 }
 0x22d   :  { %v1536_v58 = vpop.eup %1535 }
 0x22e   :  { %v1538_v44 = vpop.eup %1537  ;;  %v1322_v53 = vadd.f32 -1.0, %v1536_v58 }
 0x22f   :  { %v1540_v51 = vpop.eup %1539  ;;  %v1321_v54 = vadd.f32 -1.0, %v1538_v44 }
 0x230   :  { %v1320_v61 = vadd.f32 -1.0, %v1540_v51  ;;  %v872_v0 = vmul.f32 1.6732632, %v1322_v53 }
 0x231   :  { %v1542_v10 = vpop.eup %1541  ;;  %v871_v2 = vmul.f32 1.6732632, %v1321_v54 }
 0x232   :  { %v1323_v33 = vadd.f32 -1.0, %v1542_v10  ;;  %v1544_v57 = vpop.eup %1543  ;;  %v870_v5 = vmul.f32 1.6732632, %v1320_v61  ;;  %v884_v24 = vsel %vm812_vm0, %v791_v34, %v872_v0 }
 0x233   :  { %v1546_v60 = vpop.eup %1545  ;;  %v1319_v16 = vadd.f32 -1.0, %v1544_v57  ;;  %v883_v50 = vsel %vm811_vm4, %v2018_v47, %v871_v2  ;;  %v896_v29 = vmul.f32 1.050701, %v884_v24 }
 0x234   :  { %v873_v59 = vmul.f32 1.6732632, %v1323_v33  ;;  %v1318_v62 = vadd.f32 -1.0, %v1546_v60  ;;  %v882_v9 = vsel %vm810_vm3, %v2014_v13, %v870_v5  ;;  %v895_v18 = vmul.f32 1.050701, %v883_v50 }
 0x235   :  { %v1548_v52 = vpop.eup %1547  ;;  %v869_v12 = vmul.f32 1.6732632, %v1319_v16  ;;  %v894_v3 = vmul.f32 1.050701, %v882_v9 }
 0x236   :  { %v1324_v36 = vadd.f32 -1.0, %v1548_v52  ;;  %v1550_v37 = vpop.eup %1549  ;;  %v885_v7 = vsel %vm813_vm2, %v796_v28, %v873_v59  ;;  %v868_v17 = vmul.f32 1.6732632, %v1318_v62  ;;  %v911_v4 = vpack.c.bf16 %v896_v29, %v895_v18 }
 0x237   :  { %v1317_v25 = vadd.f32 -1.0, %v1550_v37  ;;  %v897_v14 = vmul.f32 1.050701, %v885_v7  ;;  %v881_v22 = vsel %vm809_vm6, %v2012_v32, %v869_v12 }
 0x238   :  { %v874_v8 = vmul.f32 1.6732632, %v1324_v36  ;;  %v880_v47 = vsel %vm808_vm7, %v2010_v1, %v868_v17  ;;  %v893_v34 = vmul.f32 1.050701, %v881_v22  ;;  %v1474_v1 = vld [vmem:[%s2088_s4 + $0x8] sm:$0xff]  }
 0x239   :  { %v867_v21 = vmul.f32 1.6732632, %v1317_v25  ;;  %v892_v55 = vmul.f32 1.050701, %v880_v47 }
 0x23a   :  { %v886_v30 = vsel %vm814_vm5, %v799_v11, %v874_v8  ;;  %v910_v39 = vpack.c.bf16 %v894_v3, %v893_v34 }
 0x23b   :  { %v898_v15 = vmul.f32 1.050701, %v886_v30  ;;  %v879_v13 = vsel %vm807_vm8, %v2008_v42, %v867_v21  ;;  %v1475_v42 = vld [vmem:[%s2088_s4 + $0x10] sm:$0xff]  }
 0x23c   :  { %v891_v27 = vmul.f32 1.050701, %v879_v13 }
 0x23d   :  { %v912_v63 = vpack.c.bf16 %v898_v15, %v897_v14 }
 0x23e   :  { %v909_v32 = vpack.c.bf16 %v892_v55, %v891_v27 }
 0x23f   :  { %1407 = vmatprep.subr.bf16.mxu0 %v912_v63 }
 0x240   :  { %1408 = vmatpush3.bf16.msra.mxu0 %v912_v63 }
 0x241   :  { %1409 = vmatprep.subr.bf16.mxu0 %v911_v4 }
 0x244   :  { %1410 = vmatpush3.bf16.msra.mxu0 %v911_v4 }
 0x245   :  { %1411 = vmatprep.subr.bf16.mxu0 %v910_v39 }
 0x248   :  { %1412 = vmatpush3.bf16.msra.mxu0 %v910_v39 }
 0x249   :  { %1413 = vmatprep.subr.bf16.mxu0 %v909_v32 }
 0x24c   :  { %1414 = vmatpush3.bf16.msra.mxu0 %v909_v32 }
 0x24d   :  { %1415 = vmatprep.subr.bf16.mxu0 %v2022_v23 }
 0x250   :  { %1416 = vmatpush3.bf16.msra.mxu0 %v2022_v23  ;;  %v1476_v23 = vld [vmem:[%s2088_s4 + $0x18] sm:$0xff]  }
 0x251   :  { %1417 = vmatprep.subr.bf16.mxu0 %v2016_v19 }
 0x254   :  { %1418 = vmatpush3.bf16.msra.mxu0 %v2016_v19 }
 0x257   :  { %1420 = vmatmul.mubr.msk.bf16.vlgmr.msra.gmra.mxu0 %vm933_vm11, %v1474_v1 }
 0x258   :  { %1423 = vmatprep.mubr.msk.bf16.mxu0 %vm933_vm11, %v1475_v42 }
 0x25f   :  { %1424 = vmatmul.mubr.msk.bf16.gmra.mxu0 %vm933_vm11, %v1476_v23 }
 0x260   :  { %1435 = vmatprep.mubr.msk.bf16.mxu0 %vm703_vm1, %v1477_v49 }
 0x317   :  { %v2057_v19 = vpop.f32.mrf.mxu0 }
 0x318   :  { %v1021_v28 = vmin.f32 %v2057_v19, 0.0  ;;  %vm1013_vm14 = vcmp.gt.f32.partialorder %v2057_v19, 0.0 }
 0x319   :  { %v2059_v6 = vpop.f32.mrf.mxu0 }
 0x31a   :  { %v1031_v41 = vmul.f32 1.442695, %v1021_v28  ;;  %v1019_v11 = vmin.f32 %v2059_v6, 0.0  ;;  %vm1011_vm0 = vcmp.gt.f32.partialorder %v2059_v6, 0.0 }
 0x31b   :  { %v2061_v26 = vpop.f32.mrf.mxu0 }
 0x31c   :  { %v1022_v35 = vmin.f32 %v2061_v26, 0.0  ;;  %v1027_v53 = vmul.f32 1.442695, %v1019_v11  ;;  %vm1014_vm12 = vcmp.gt.f32.partialorder %v2061_v26, 0.0 }
 0x31d   :  { %v2065_v31 = vpop.f32.mrf.mxu0 }
 0x31e   :  { %v1033_v48 = vmul.f32 1.442695, %v1022_v35  ;;  %v1020_v38 = vmin.f32 %v2065_v31, 0.0  ;;  %vm1012_vm15 = vcmp.gt.f32.partialorder %v2065_v31, 0.0 }
 0x31f   :  { %v1425_v40 = vpop.f32.mrf.mxu0 }
 0x320   :  { %v1025_v20 = vmin.f32 %v1425_v40, 0.0  ;;  %1551 = vpow2.f32 %v1033_v48  ;;  %v1029_v46 = vmul.f32 1.442695, %v1020_v38  ;;  %vm1017_vm9 = vcmp.gt.f32.partialorder %v1425_v40, 0.0  ;;  %v1478_v48 = vld [vmem:[%s2089_s5 + $0x8] sm:$0xff]   ;;  %s1600_s5 = smov [#allocation3]  }
 0x321   :  { %v996_v56 = vpop.f32.mrf.mxu0  ;;  %s1239_s25 = sshll.u32 %s1600_s5, 4  ;;  %s1240_s25 = int_to_ptr.vmem [resolvable:$true] %s1239_s25 }
 0x322   :  { %v1039_v43 = vmul.f32 1.442695, %v1025_v20  ;;  %v1023_v45 = vmin.f32 %v996_v56, 0.0  ;;  %vm1015_vm10 = vcmp.gt.f32.partialorder %v996_v56, 0.0  ;;  %s1577_s26 = scalar_lea.vmem %s1240_s25, 16  ;;  %s1581_s27 = scalar_lea.vmem %s1240_s25, 32 }
 0x323   :  { %v1426_v58 = vpop.f32.mrf.mxu0  ;;  %p1578_p0 = scmp.ne.s32.totalorder %s1240_s25, %s1577_s26  ;;  %p1582_p1 = scmp.lt.s32.totalorder %s1240_s25, %s1240_s25 }
 0x324   :  { %1553 = vpow2.f32 %v1039_v43  ;;  %v1035_v44 = vmul.f32 1.442695, %v1023_v45  ;;  %v1026_v51 = vmin.f32 %v1426_v58, 0.0  ;;  %vm1018_vm11 = vcmp.gt.f32.partialorder %v1426_v58, 0.0  ;;  %p1583_p2 = scmp.lt.s32.totalorder %s1581_s27, %s1577_s26 }
 0x325   :  { %1555 = vpow2.f32 %v1031_v41  ;;  %v999_v10 = vpop.f32.mrf.mxu0 }
 0x326   :  { %1557 = vpow2.f32 %v1035_v44  ;;  %v1041_v54 = vmul.f32 1.442695, %v1026_v51  ;;  %v1024_v33 = vmin.f32 %v999_v10, 0.0  ;;  %vm1016_vm13 = vcmp.gt.f32.partialorder %v999_v10, 0.0  ;;  %p1584_p3 = por %p1583_p2, %p1582_p1 }
 0x327   :  { %1559 = vpow2.f32 %v1029_v46 }
 0x328   :  { %1561 = vpow2.f32 %v1041_v54  ;;  %v1037_v57 = vmul.f32 1.442695, %v1024_v33  ;;  %p1585_p4 = pnand %p1584_p3, %p1578_p0 }
 0x329   :  { %1563 = vpow2.f32 %v1027_v53 }
 0x32a   :  { %1565 = vpow2.f32 %v1037_v57 }
 0x32d   :  { %v1552_v60 = vpop.eup %1551 }
 0x32e   :  { %v1336_v16 = vadd.f32 -1.0, %v1552_v60 }
 0x330   :  { %v1054_v12 = vmul.f32 1.6732632, %v1336_v16  ;;  %v1187_v16 = vpop.permute.xlu0 %1186 }
 0x331   :  { %v1554_v61 = vpop.eup %1553 }
 0x332   :  { %v1556_v0 = vpop.eup %1555  ;;  %v1339_v59 = vadd.f32 -1.0, %v1554_v61  ;;  %v1062_v3 = vsel %vm1014_vm12, %v2061_v26, %v1054_v12 }
 0x333   :  { %v1558_v52 = vpop.eup %1557  ;;  %v1335_v5 = vadd.f32 -1.0, %v1556_v0  ;;  %v1070_v32 = vmul.f32 1.050701, %v1062_v3 }
 0x334   :  { %v1560_v2 = vpop.eup %1559  ;;  %v1057_v36 = vmul.f32 1.6732632, %v1339_v59  ;;  %v1337_v37 = vadd.f32 -1.0, %v1558_v52 }
 0x335   :  { %v1562_v62 = vpop.eup %1561  ;;  %v1334_v50 = vadd.f32 -1.0, %v1560_v2  ;;  %v1053_v15 = vmul.f32 1.6732632, %v1335_v5 }
 0x336   :  { %v1564_v24 = vpop.eup %1563  ;;  %v1055_v7 = vmul.f32 1.6732632, %v1337_v37  ;;  %v1340_v8 = vadd.f32 -1.0, %v1562_v62  ;;  %v1065_v30 = vsel %vm1017_vm9, %v1425_v40, %v1057_v36  ;;  %v1192_v62 = vpop.permute.xlu1 %1191 }
 0x337   :  { %v1566_v25 = vpop.eup %1565  ;;  %v1333_v17 = vadd.f32 -1.0, %v1564_v24  ;;  %v1073_v21 = vmul.f32 1.050701, %v1065_v30  ;;  %v1052_v4 = vmul.f32 1.6732632, %v1334_v50  ;;  %v1061_v39 = vsel %vm1013_vm14, %v2057_v19, %v1053_v15  ;;  %v1197_v30 = vpop.permute.xlu0 %1196 }
 0x338   :  { %v1058_v29 = vmul.f32 1.6732632, %v1340_v8  ;;  %v1338_v14 = vadd.f32 -1.0, %v1566_v25  ;;  %v1063_v9 = vsel %vm1015_vm10, %v996_v56, %v1055_v7  ;;  %v1069_v23 = vmul.f32 1.050701, %v1061_v39 }
 0x339   :  { %v1071_v34 = vmul.f32 1.050701, %v1063_v9  ;;  %v1051_v27 = vmul.f32 1.6732632, %v1333_v17  ;;  %v1060_v42 = vsel %vm1012_vm15, %v2065_v31, %v1052_v4 }
 0x33a   :  { %v1066_v18 = vsel %vm1018_vm11, %v1426_v58, %v1058_v29  ;;  %v1056_v63 = vmul.f32 1.6732632, %v1338_v14  ;;  %v1068_v26 = vmul.f32 1.050701, %v1060_v42  ;;  %v1080_v35 = vpack.c.bf16 %v1070_v32, %v1069_v23  ;;  %v1202_v15 = vpop.permute.xlu1 %1201 }
 0x33b   :  { %v1074_v22 = vmul.f32 1.050701, %v1066_v18  ;;  %v1059_v49 = vsel %vm1011_vm0, %v2059_v6, %v1051_v27  ;;  %v1223_v18 = vlaneseq }
 0x33c   :  { %v1064_v47 = vsel %vm1016_vm13, %v999_v10, %v1056_v63  ;;  %v1067_v28 = vmul.f32 1.050701, %v1059_v49 }
 0x33d   :  { %v1072_v13 = vmul.f32 1.050701, %v1064_v47  ;;  %v1082_v55 = vpack.c.bf16 %v1074_v22, %v1073_v21  ;;  %v1224_v22 = vshrl.u32 %v1223_v18, 7 }
 0x33e   :  { %v1079_v19 = vpack.c.bf16 %v1068_v26, %v1067_v28 }
 0x33f   :  { %1427 = vmatprep.subr.bf16.mxu0 %v1082_v55  ;;  %v1081_v1 = vpack.c.bf16 %v1072_v13, %v1071_v34  ;;  %v1225_v47 = vsub.s32 0, %v1224_v22  ;;  %v1221_v13 = vpop.permute.xlu0 %1220 }
 0x340   :  { %1428 = vmatpush3.bf16.msra.mxu0 %v1082_v55 }
 0x341   :  { %1429 = vmatprep.subr.bf16.mxu0 %v1081_v1  ;;  %v1226_v39 = vrot.slane %v1221_v13, %v1225_v47 }
 0x344   :  { %1430 = vmatpush3.bf16.msra.mxu0 %v1081_v1 }
 0x345   :  { %1431 = vmatprep.subr.bf16.mxu0 %v1080_v35 }
 0x348   :  { %1432 = vmatpush3.bf16.msra.mxu0 %v1080_v35 }
 0x349   :  { %1433 = vmatprep.subr.bf16.mxu0 %v1079_v19 }
 0x34c   :  { %1434 = vmatpush3.bf16.msra.mxu0 %v1079_v19 }
 0x34f   :  { %1436 = vmatmul.mubr.msk.bf16.vlgmr.msra.gmra.mxu0 %vm703_vm1, %v1478_v48 }
 0x40f   :  { %v1437_v31 = vpop.f32.mrf.mxu0 }
 0x410   :  { %v1154_v38 = vmin.f32 %v1437_v31, 0.0  ;;  %vm1150_vm2 = vcmp.gt.f32.partialorder %v1437_v31, 0.0 }
 0x411   :  { %v1133_v40 = vpop.f32.mrf.mxu0 }
 0x412   :  { %v1160_v20 = vmul.f32 1.442695, %v1154_v38  ;;  %v1152_v6 = vmin.f32 %v1133_v40, 0.0  ;;  %vm1148_vm1 = vcmp.gt.f32.partialorder %v1133_v40, 0.0 }
 0x413   :  { %v1438_v41 = vpop.f32.mrf.mxu0 }
 0x414   :  { %1567 = vpow2.f32 %v1160_v20  ;;  %v1156_v11 = vmul.f32 1.442695, %v1152_v6  ;;  %v1155_v56 = vmin.f32 %v1438_v41, 0.0  ;;  %vm1151_vm3 = vcmp.gt.f32.partialorder %v1438_v41, 0.0 }
 0x415   :  { %v1136_v43 = vpop.f32.mrf.mxu0 }
 0x416   :  { %1569 = vpow2.f32 %v1156_v11  ;;  %v1162_v45 = vmul.f32 1.442695, %v1155_v56  ;;  %v1153_v46 = vmin.f32 %v1136_v43, 0.0  ;;  %vm1149_vm4 = vcmp.gt.f32.partialorder %v1136_v43, 0.0 }
 0x418   :  { %1571 = vpow2.f32 %v1162_v45  ;;  %v1158_v58 = vmul.f32 1.442695, %v1153_v46 }
 0x41a   :  { %1573 = vpow2.f32 %v1158_v58 }
 0x421   :  { %v1568_v44 = vpop.eup %1567 }
 0x422   :  { %v1347_v51 = vadd.f32 -1.0, %v1568_v44 }
 0x423   :  { %v1570_v53 = vpop.eup %1569 }
 0x424   :  { %v1345_v10 = vadd.f32 -1.0, %v1570_v53  ;;  %v1170_v33 = vmul.f32 1.6732632, %v1347_v51 }
 0x425   :  { %v1572_v54 = vpop.eup %1571 }
 0x426   :  { %v1168_v57 = vmul.f32 1.6732632, %v1345_v10  ;;  %v1348_v60 = vadd.f32 -1.0, %v1572_v54  ;;  %v1174_v2 = vsel %vm1150_vm2, %v1437_v31, %v1170_v33 }
 0x427   :  { %v1574_v61 = vpop.eup %1573  ;;  %v1178_v7 = vmul.f32 1.050701, %v1174_v2 }
 0x428   :  { %v1172_v0 = vsel %vm1148_vm1, %v1133_v40, %v1168_v57  ;;  %v1171_v59 = vmul.f32 1.6732632, %v1348_v60  ;;  %v1346_v52 = vadd.f32 -1.0, %v1574_v61 }
 0x429   :  { %v1176_v37 = vmul.f32 1.050701, %v1172_v0  ;;  %v1206_v29 = vmul.f32 %v1197_v30, %v1178_v7 }
 0x42a   :  { %v1169_v36 = vmul.f32 1.6732632, %v1346_v52  ;;  %v1175_v5 = vsel %vm1151_vm3, %v1438_v41, %v1171_v59 }
 0x42b   :  { %v1204_v25 = vmul.f32 %v1187_v16, %v1176_v37  ;;  %v1179_v12 = vmul.f32 1.050701, %v1175_v5 }
 0x42c   :  { %v1173_v24 = vsel %vm1149_vm4, %v1136_v43, %v1169_v36 }
 0x42d   :  { %v1177_v8 = vmul.f32 1.050701, %v1173_v24  ;;  %v1207_v17 = vmul.f32 %v1202_v15, %v1179_v12 }
 0x42f   :  { %v1205_v50 = vmul.f32 %v1192_v62, %v1177_v8 }
 0x431   :  { %v1208_v14 = vadd.f32 %v1205_v50, %v1204_v25 }
 0x433   :  { %v1209_v9 = vadd.f32 %v1208_v14, %v1206_v29 }
 0x435   :  { %v1210_v63 = vadd.f32 %v1209_v9, %v1207_v17 }
 0x437   :  { %v1211_v21 = vrot.slane %v1210_v63, 4 }
 0x439   :  { %v1212_v3 = vadd.f32 %v1211_v21, %v1210_v63 }
 0x43b   :  { %v1213_v4 = vrot.slane %v1212_v3, 2 }
 0x43d   :  { %v1214_v34 = vadd.f32 %v1213_v4, %v1212_v3 }
 0x43f   :  { %v1215_v55 = vrot.slane %v1214_v34, 1 }
 0x441   :  { %v1216_v27 = vadd.f32 %v1215_v55, %v1214_v34 }
 0x443   :  { %v1227_v32 = vadd.f32 %v1226_v39, %v1216_v27 }
 0x445   :  { %v1228_v1 = vmul.f32 0.5, %v1227_v32 }
 0x447   :  { %1575 = vtanh.f32 %v1228_v1 }
 0x454   :  { %v1576_v42 = vpop.eup %1575 }
 0x455   :  { %v1230_v23 = vmul.f32 0.5, %v1576_v42 }
 0x457   :  { %v1231_v49 = vadd.f32 0.5, %v1230_v23 }
 0x459   :  { %1232 = vst [vmem:[#allocation3] sm:$0x1] %v1231_v49 }
 0x45a   :  { %1588 = shalt.err (!%p1585_p4)
}
 0x45b   :  { %1242 = dma.vmem_to_hbm [thread:$0]  %s1240_s25, 16, %s2092_s8, [#allocation4]  }
 0x45c   :  { %1597 = dma.done.wait [#allocation4], 16  }
 0x45d   :  { %1598 = vsyncadd [#allocation4], 4294967280 }
 0x45e   :  { %1246 = vsyncpa [#allocation4], 1 }

</bundles_post_ra>
